<compile_context>
chip_gen: v7x
topology: tpu7x:2x2x1
jax: 0.10.0
libtpu: 0.0.40
codegen_flags: <defaults>
</compile_context>

<pallas_src>
import jax
import jax.numpy as jnp
from jax import lax
from jax.experimental import pallas as pl
from jax.experimental.pallas import tpu as pltpu


def _is_pow2(n: int) -> bool:
    return n > 0 and (n & (n - 1)) == 0


def _idiv(a, d: int):
    """Integer divide by a compile-time constant (shift when power of two)."""
    if _is_pow2(d):
        return a >> (d.bit_length() - 1)
    return a // d


def _imod(a, d: int):
    """Integer modulo by a compile-time constant (mask when power of two)."""
    if _is_pow2(d):
        return a & (d - 1)
    return a % d


def _make_kernel(C: int, H: int, W: int, T: int, row_tile: int):
    """Kernel over a (row_tile, H*W*T) block of the (B*C, H*W*T) slab."""
    WT = W * T

    def kernel(x_ref, clamped_ref, spike_ref):
        x = x_ref[...]                                   # (row_tile, L) f32
        clamped = jnp.clip(x, 0.0, 1.0)                  # torch.clamp(x, 0, 1)
        clamped_ref[...] = clamped.astype(clamped_ref.dtype)

        shape = x.shape
        # row = b*C + c ; lane = h*(W*T) + w*T + t  (native row-major layout)
        row = lax.broadcasted_iota(jnp.int32, shape, 0) + pl.program_id(0) * row_tile
        lane = lax.broadcasted_iota(jnp.int32, shape, 1)

        c = _imod(row, C)
        h = _idiv(lane, WT)
        w = _imod(_idiv(lane, T), W)

        # Neo hardware address (shift/mask form of //4 and %4).
        grp = 64 * ((w >> 2) + (h >> 2) * 8 + (c >> 2) * 64)
        dec = (w & 3) + (h & 3) * 4 + (c & 3) * 16
        addr = grp + dec

        # torch.where(x) selects the nonzero entries of the clamped tensor.
        spike = jnp.where(clamped != 0.0, addr, jnp.int32(-1))
        spike_ref[...] = spike.astype(spike_ref.dtype)

    return kernel


def eval_cnet_nmnist_forward(x_bchwt, num_classes, T):
    """JAX/Pallas equivalent of EVAL_cNet_NMNIST(T).forward.

    Args:
      x_bchwt: float array of shape (B, C, H, W, T) (PyTorch layout).
      num_classes: number of output classes.
      T: number of time steps (must equal x_bchwt.shape[-1]).

    Returns:
      output_neo: (1, num_classes) float32 — identical to PyTorch (zeros / T).
      clamped:    (B, C, H, W, T) bfloat16 — clamp(x, 0, 1).
      spike_idx:  (B, C, H, W, T) int16/int32 — Neo input address where a
                  spike is present, -1 elsewhere.
    """
    B, C, H, W, Tin = x_bchwt.shape
    assert Tin == T, "last axis of input must equal T"

    R = B * C            # sublane/row axis of the flat view
    L = H * W * T        # lane axis (kept lane-dense; no transpose needed)

    # Choose the spike-index dtype: int16 when the Neo address range fits.
    max_addr = (64 * (((W - 1) >> 2) + ((H - 1) >> 2) * 8 + ((C - 1) >> 2) * 64)
                + ((W - 1) & 3) + ((H - 1) & 3) * 4 + ((C - 1) & 3) * 16)
    idx_dtype = jnp.int16 if max_addr < 2 ** 15 else jnp.int32
    idx_bytes = jnp.dtype(idx_dtype).itemsize

    # Free reshape (contiguous) — the original permute(4,0,1,2,3) is never
    # materialized; the address math recovers (c, h, w) from the flat indices.
    x_flat = x_bchwt.astype(jnp.float32).reshape(R, L)

    # Row-tile sizing against a conservative VMEM budget (safe on v7x's
    # 64 MiB physical / 32 MiB default-scoped VMEM, plenty on v5e/v6e).
    bytes_per_row = L * (4 + 2 + idx_bytes) * 2          # in + outs, double-buffered
    vmem_budget = 8 << 20
    if R * bytes_per_row <= vmem_budget:
        row_tile = R                                     # whole slab, single grid step
    else:
        cap = max(1, vmem_budget // bytes_per_row)
        cands = [d for d in range(16, R, 16) if R % d == 0 and d <= cap]
        row_tile = max(cands) if cands else R            # fallback: no row tiling

    grid = (R // row_tile,)

    clamped_flat, spike_flat = pl.pallas_call(
        _make_kernel(C, H, W, T, row_tile),
        out_shape=(
            jax.ShapeDtypeStruct((R, L), jnp.bfloat16),  # clamped spikes
            jax.ShapeDtypeStruct((R, L), idx_dtype),     # Neo spike addresses
        ),
        grid=grid,
        in_specs=[pl.BlockSpec((row_tile, L), lambda i: (i, 0))],
        out_specs=(
            pl.BlockSpec((row_tile, L), lambda i: (i, 0)),
            pl.BlockSpec((row_tile, L), lambda i: (i, 0)),
        ),
        compiler_params=pltpu.CompilerParams(
            dimension_semantics=("parallel",)),          # independent row blocks
    )(x_flat)

    # o_layer_spike is never written by the host loop -> result is zeros / T.
    output_neo = jnp.zeros((1, num_classes), jnp.float32) / jnp.float32(T)

    clamped = clamped_flat.reshape(B, C, H, W, T)
    spike_idx = spike_flat.reshape(B, C, H, W, T)
    return output_neo, clamped, spike_idx


if __name__ == "__main__":
    # Small shapes consistent with an NMNIST-style event tensor (B,C,H,W,T).
    B, C, H, W, T = 2, 4, 16, 16, 8
    num_classes = 10

    key = jax.random.PRNGKey(0)
    # Values in {0.0, 2.0} so both the clamp and the spike mask are exercised.
    x = (jax.random.uniform(key, (B, C, H, W, T)) > 0.7).astype(jnp.float32) * 2.0

    output_neo, clamped, spike_idx = eval_cnet_nmnist_forward(x, num_classes, T)
    jax.block_until_ready((output_neo, clamped, spike_idx))

    # --- correctness checks against the reference semantics ----------------
    assert output_neo.shape == (1, num_classes)
    assert bool(jnp.all(output_neo == 0.0))

    ref_clamped = jnp.clip(x, 0.0, 1.0)
    assert bool(jnp.all(clamped.astype(jnp.float32) == ref_clamped))

    c_i = jnp.arange(C).reshape(1, C, 1, 1, 1)
    h_i = jnp.arange(H).reshape(1, 1, H, 1, 1)
    w_i = jnp.arange(W).reshape(1, 1, 1, W, 1)
    ref_addr = (64 * (w_i // 4 + (h_i // 4) * 8 + (c_i // 4) * 64)
                + (w_i % 4) + (h_i % 4) * 4 + (c_i % 4) * 16).astype(jnp.int32)
    ref_spike = jnp.where(ref_clamped != 0.0, ref_addr, jnp.int32(-1))
    assert bool(jnp.all(spike_idx.astype(jnp.int32) == ref_spike))

    print("KERNEL_OK")
</pallas_src>

<mosaic_0001>
module attributes {stable_mosaic.version = 11 : i64} {
  func.func @kernel(%arg0: i32, %arg1: memref<8x2048xf32, #tpu.memory_space<vmem>>, %arg2: memref<8x2048xbf16, #tpu.memory_space<vmem>>, %arg3: memref<8x2048xi16, #tpu.memory_space<vmem>>) attributes {dimension_semantics = [#tpu.dimension_semantics<parallel>], iteration_bounds = array<i64: 1>, scalar_prefetch = 0 : i64, scratch_operands = 0 : i64, tpu.core_type = #tpu.core_type<tc>, window_params = [{transform_indices = @transform_0, window_bounds = array<i64: 8, 2048>}, {transform_indices = @transform_1, window_bounds = array<i64: 8, 2048>}, {transform_indices = @transform_2, window_bounds = array<i64: 8, 2048>}]} {
    %c0 = arith.constant 0 : index
    %c0_0 = arith.constant 0 : index
    %0 = vector.load %arg1[%c0, %c0_0] : memref<8x2048xf32, #tpu.memory_space<vmem>>, vector<8x2048xf32>
    %cst = arith.constant 0.000000e+00 : f32
    %cst_1 = arith.constant 1.000000e+00 : f32
    %1 = vector.broadcast %cst : f32 to vector<8x2048xf32>
    %2 = arith.maximumf %1, %0 : vector<8x2048xf32>
    %3 = vector.broadcast %cst_1 : f32 to vector<8x2048xf32>
    %4 = arith.minimumf %3, %2 : vector<8x2048xf32>
    %5 = arith.truncf %4 : vector<8x2048xf32> to vector<8x2048xbf16>
    %c0_2 = arith.constant 0 : index
    %c0_3 = arith.constant 0 : index
    %6 = vector.load %arg2[%c0_2, %c0_3] : memref<8x2048xbf16, #tpu.memory_space<vmem>>, vector<8x2048xbf16>
    tpu.vector_store %arg2[%c0_2, %c0_3], %5 {strides = array<i32>} : memref<8x2048xbf16, #tpu.memory_space<vmem>>, vector<8x2048xbf16>,
    %7 = tpu.iota {dimensions = array<i32: 0>} : vector<8x2048xi32>
    %c8_i32 = arith.constant 8 : i32
    %8 = arith.muli %arg0, %c8_i32 : i32
    %9 = vector.broadcast %8 : i32 to vector<8x2048xi32>
    %10 = arith.addi %7, %9 : vector<8x2048xi32>
    %11 = tpu.iota {dimensions = array<i32: 1>} : vector<8x2048xi32>
    %c3_i32 = arith.constant 3 : i32
    %12 = vector.broadcast %c3_i32 : i32 to vector<8x2048xi32>
    %13 = arith.andi %10, %12 : vector<8x2048xi32>
    %c7_i32 = arith.constant 7 : i32
    %14 = vector.broadcast %c7_i32 : i32 to vector<8x2048xi32>
    %15 = arith.shrsi %11, %14 : vector<8x2048xi32>
    %c3_i32_4 = arith.constant 3 : i32
    %16 = vector.broadcast %c3_i32_4 : i32 to vector<8x2048xi32>
    %17 = arith.shrsi %11, %16 : vector<8x2048xi32>
    %c15_i32 = arith.constant 15 : i32
    %18 = vector.broadcast %c15_i32 : i32 to vector<8x2048xi32>
    %19 = arith.andi %17, %18 : vector<8x2048xi32>
    %c2_i32 = arith.constant 2 : i32
    %20 = vector.broadcast %c2_i32 : i32 to vector<8x2048xi32>
    %21 = arith.shrsi %19, %20 : vector<8x2048xi32>
    %c2_i32_5 = arith.constant 2 : i32
    %22 = vector.broadcast %c2_i32_5 : i32 to vector<8x2048xi32>
    %23 = arith.shrsi %15, %22 : vector<8x2048xi32>
    %c8_i32_6 = arith.constant 8 : i32
    %24 = vector.broadcast %c8_i32_6 : i32 to vector<8x2048xi32>
    %25 = arith.muli %23, %24 : vector<8x2048xi32>
    %26 = arith.addi %21, %25 : vector<8x2048xi32>
    %c2_i32_7 = arith.constant 2 : i32
    %27 = vector.broadcast %c2_i32_7 : i32 to vector<8x2048xi32>
    %28 = arith.shrsi %13, %27 : vector<8x2048xi32>
    %c64_i32 = arith.constant 64 : i32
    %29 = vector.broadcast %c64_i32 : i32 to vector<8x2048xi32>
    %30 = arith.muli %28, %29 : vector<8x2048xi32>
    %31 = arith.addi %26, %30 : vector<8x2048xi32>
    %c64_i32_8 = arith.constant 64 : i32
    %32 = vector.broadcast %c64_i32_8 : i32 to vector<8x2048xi32>
    %33 = arith.muli %32, %31 : vector<8x2048xi32>
    %c3_i32_9 = arith.constant 3 : i32
    %34 = vector.broadcast %c3_i32_9 : i32 to vector<8x2048xi32>
    %35 = arith.andi %19, %34 : vector<8x2048xi32>
    %c3_i32_10 = arith.constant 3 : i32
    %36 = vector.broadcast %c3_i32_10 : i32 to vector<8x2048xi32>
    %37 = arith.andi %15, %36 : vector<8x2048xi32>
    %c4_i32 = arith.constant 4 : i32
    %38 = vector.broadcast %c4_i32 : i32 to vector<8x2048xi32>
    %39 = arith.muli %37, %38 : vector<8x2048xi32>
    %40 = arith.addi %35, %39 : vector<8x2048xi32>
    %c3_i32_11 = arith.constant 3 : i32
    %41 = vector.broadcast %c3_i32_11 : i32 to vector<8x2048xi32>
    %42 = arith.andi %13, %41 : vector<8x2048xi32>
    %c16_i32 = arith.constant 16 : i32
    %43 = vector.broadcast %c16_i32 : i32 to vector<8x2048xi32>
    %44 = arith.muli %42, %43 : vector<8x2048xi32>
    %45 = arith.addi %40, %44 : vector<8x2048xi32>
    %46 = arith.addi %33, %45 : vector<8x2048xi32>
    %cst_12 = arith.constant 0.000000e+00 : f32
    %47 = vector.broadcast %cst_12 : f32 to vector<8x2048xf32>
    %48 = arith.cmpf one, %4, %47 : vector<8x2048xf32>
    %c-1_i32 = arith.constant -1 : i32
    %49 = vector.broadcast %c-1_i32 : i32 to vector<8x2048xi32>
    %50 = arith.select %48, %46, %49 : vector<8x2048xi1>, vector<8x2048xi32>
    %51 = arith.trunci %50 : vector<8x2048xi32> to vector<8x2048xi16>
    %c0_13 = arith.constant 0 : index
    %c0_14 = arith.constant 0 : index
    %52 = vector.load %arg3[%c0_13, %c0_14] : memref<8x2048xi16, #tpu.memory_space<vmem>>, vector<8x2048xi16>
    tpu.vector_store %arg3[%c0_13, %c0_14], %51 {strides = array<i32>} : memref<8x2048xi16, #tpu.memory_space<vmem>>, vector<8x2048xi16>,
    return
  }
  func.func @transform_0(%arg0: i32) -> (i32, i32) {
    %c0_i32 = arith.constant 0 : i32
    %c0_i32_0 = arith.constant 0 : i32
    return %arg0, %c0_i32 : i32, i32
  }
  func.func @transform_1(%arg0: i32) -> (i32, i32) {
    %c0_i32 = arith.constant 0 : i32
    %c0_i32_0 = arith.constant 0 : i32
    return %arg0, %c0_i32 : i32, i32
  }
  func.func @transform_2(%arg0: i32) -> (i32, i32) {
    %c0_i32 = arith.constant 0 : i32
    %c0_i32_0 = arith.constant 0 : i32
    return %arg0, %c0_i32 : i32, i32
  }
}

</mosaic_0001>

<bundles_post_ra>
// kernel: tpu_custom_call.1
= control target key start
LH: loop header
LB: loop body
LE: loop exit
PB: predicated region body
PF: predicated region fallthrough
CT: control target
= control target key end

     0   :  { %8 = vsyncpa [#allocation3], 0  ;;  %s814_s0 = inlined_call_operand.hbm [shape: f32[8,2048], index: 0, kind: input, shape index: {}]   ;;  %s815_s1 = inlined_call_operand.hbm [shape: bf16[8,2048], index: 1, kind: output, shape index: {0}]   ;;  %s816_s2 = inlined_call_operand.hbm [shape: s16[8,2048], index: 2, kind: output, shape index: {1}]  }
   0x1   :  { %9 = vsyncpa [#allocation4], 0 }
   0x2   :  { %10 = vsyncpa [#allocation7], 0  ;;  %s578_s9 = smov [#allocation2]   ;;  %s506_s13 = scalar_lea.hbm %s814_s0, 2048 }
   0x3   :  { %s17_s10 = sshll.u32 %s578_s9, 4  ;;  %p507_p0 = scmp.ne.s32.totalorder %s814_s0, %s506_s13  ;;  %s18_s10 = int_to_ptr.vmem [resolvable:$true] %s17_s10 }
   0x4   :  { %p510_p1 = scmp.lt.u32.totalorder %s506_s13, %s814_s0 }
   0x6   :  { %p512_p2 = pnand %p510_p1, %p507_p0 }
   0x8   :  { %515 = shalt.err (!%p512_p2)
}
   0x9   :  { %s516_s18 = scalar_lea.vmem %s18_s10, 2048  ;;  %p521_p4 = scmp.lt.s32.totalorder %s18_s10, %s18_s10 }
   0xa   :  { %p517_p3 = scmp.ne.s32.totalorder %s18_s10, %s516_s18  ;;  %p522_p5 = scmp.lt.s32.totalorder %s516_s18, %s516_s18 }
   0xc   :  { %p523_p6 = por %p522_p5, %p521_p4 }
   0xe   :  { %p524_p7 = pnand %p523_p6, %p517_p3 }
  0x10   :  { %527 = shalt.err (!%p524_p7)
}
  0x11   :  { %20 = dma.hbm_to_vmem [thread:$0]  %s814_s0, 2048, %s18_s10, [#allocation3]  }
  0x12   :  { %572 = dma.done.wait [#allocation3], 2048  }
  0x13   :  { %573 = vsyncadd [#allocation3], 4294965248  ;;  %v144_v0 = vlaneseq  ;;  %v24_v15 = vld [vmem:[#allocation2] sm:$0xff]  ;;  %v25_v16 = vld [vmem:[#allocation2 + $0x8] sm:$0xff]  ;;  %s579_s0 = smov [#allocation5]  }
  0x14   :  { %v26_v17 = vld [vmem:[#allocation2 + $0x10] sm:$0xff]  ;;  %v40_v21 = vmax.f32 %v24_v15, 0.0  ;;  %v41_v22 = vmax.f32 %v25_v16, 0.0  ;;  %v27_v23 = vld [vmem:[#allocation2 + $0x18] sm:$0xff]  ;;  %v28_v25 = vld [vmem:[#allocation2 + $0x20] sm:$0xff]  ;;  %s464_s21 = sshll.u32 %s579_s0, 4  ;;  %s465_s21 = int_to_ptr.vmem [resolvable:$true] %s464_s21 }
  0x15   :  { %v145_v1 = vshrl.u32 %v144_v0, 7  ;;  %v608_v2 = vand.u32 127, %v144_v0  ;;  %v42_v24 = vmax.f32 %v26_v17, 0.0  ;;  %v29_v26 = vld [vmem:[#allocation2 + $0x28] sm:$0xff]  ;;  %v43_v27 = vmax.f32 %v27_v23, 0.0  ;;  %v30_v30 = vld [vmem:[#allocation2 + $0x30] sm:$0xff]  ;;  %p533_p9 = scmp.lt.s32.totalorder %s465_s21, %s465_s21 }
  0x16   :  { %v44_v28 = vmax.f32 %v28_v25, 0.0  ;;  %v45_v29 = vmax.f32 %v29_v26, 0.0  ;;  %v31_v31 = vld [vmem:[#allocation2 + $0x38] sm:$0xff]  ;;  %v32_v32 = vld [vmem:[#allocation2 + $0x40] sm:$0xff]  ;;  %v639_v33 = vmin.f32 %v40_v21, 1.0  ;;  %v641_v34 = vmin.f32 %v41_v22, 1.0 }
  0x17   :  { %v611_v3 = vadd.s32 128, %v608_v2  ;;  %v166_v4 = vand.u32 3, %v145_v1  ;;  %v167_v5 = vshra.s32 %v608_v2, 7  ;;  %v183_v6 = vshra.s32 %v608_v2, 3  ;;  %v33_v37 = vld [vmem:[#allocation2 + $0x48] sm:$0xff]  ;;  %v34_v38 = vld [vmem:[#allocation2 + $0x50] sm:$0xff] }
  0x18   :  { %v616_v7 = vadd.s32 256, %v608_v2  ;;  %v619_v8 = vadd.s32 384, %v608_v2  ;;  %v622_v9 = vadd.s32 512, %v608_v2  ;;  %v625_v10 = vadd.s32 640, %v608_v2  ;;  %v35_v43 = vld [vmem:[#allocation2 + $0x58] sm:$0xff]  ;;  %v36_v44 = vld [vmem:[#allocation2 + $0x60] sm:$0xff] }
  0x19   :  { %v168_v11 = vshra.s32 %v611_v3, 7  ;;  %v184_v12 = vshra.s32 %v611_v3, 3  ;;  %v629_v13 = vand.u32 15, %v183_v6  ;;  %v631_v14 = vshra.s32 %v167_v5, 2  ;;  %v37_v49 = vld [vmem:[#allocation2 + $0x68] sm:$0xff]  ;;  %v38_v50 = vld [vmem:[#allocation2 + $0x70] sm:$0xff] }
  0x1a   :  { %v633_v18 = vshra.s32 %v166_v4, 2  ;;  %v635_v19 = vand.u32 3, %v167_v5  ;;  %v637_v20 = vmul.u32 16, %v166_v4  ;;  %v643_v35 = vmin.f32 %v42_v24, 1.0  ;;  %v39_v55 = vld [vmem:[#allocation2 + $0x78] sm:$0xff]  ;;  %s528_s22 = scalar_lea.vmem %s465_s21, 1024 }
  0x1b   :  { %v46_v36 = vmax.f32 %v30_v30, 0.0  ;;  %v645_v39 = vmin.f32 %v43_v27, 1.0  ;;  %v647_v40 = vmin.f32 %v44_v28, 1.0  ;;  %v649_v41 = vmin.f32 %v45_v29, 1.0  ;;  %p529_p8 = scmp.ne.s32.totalorder %s465_s21, %s528_s22  ;;  %p534_p10 = scmp.lt.s32.totalorder %s528_s22, %s528_s22 }
  0x1c   :  { %v47_v42 = vmax.f32 %v31_v31, 0.0  ;;  %v495_v45 = vpack.c.bf16 %v641_v34, %v639_v33  ;;  %v48_v47 = vmax.f32 %v32_v32, 0.0  ;;  %v49_v48 = vmax.f32 %v33_v37, 0.0 }
  0x1d   :  { %v653_v46 = vmin.f32 %v46_v36, 1.0  ;;  %v496_v51 = vpack.c.bf16 %v645_v39, %v643_v35  ;;  %v497_v52 = vpack.c.bf16 %v649_v41, %v647_v40  ;;  %v50_v54 = vmax.f32 %v34_v38, 0.0  ;;  %p535_p11 = por %p534_p10, %p533_p9 }
  0x1e   :  { %v659_v53 = vmin.f32 %v47_v42, 1.0  ;;  %136 = vst [vmem:[#allocation5] sm:$0xff] %v495_v45  ;;  %v661_v56 = vmin.f32 %v48_v47, 1.0  ;;  %v663_v57 = vmin.f32 %v49_v48, 1.0  ;;  %v51_v58 = vmax.f32 %v35_v43, 0.0 }
  0x1f   :  { %v52_v59 = vmax.f32 %v36_v44, 0.0  ;;  %137 = vst [vmem:[#allocation5 + $0x8] sm:$0xff] %v496_v51  ;;  %138 = vst [vmem:[#allocation5 + $0x10] sm:$0xff] %v497_v52  ;;  %v667_v61 = vmin.f32 %v50_v54, 1.0  ;;  %v53_v62 = vmax.f32 %v37_v49, 0.0  ;;  %v54_v63 = vmax.f32 %v38_v50, 0.0  ;;  %p536_p12 = pnand %p535_p11, %p529_p8 }
  0x20   :  { %v498_v60 = vpack.c.bf16 %v659_v53, %v653_v46  ;;  %v499_v0 = vpack.c.bf16 %v663_v57, %v661_v56  ;;  %v671_v1 = vmin.f32 %v51_v58, 1.0  ;;  %v55_v5 = vmax.f32 %v39_v55, 0.0 }
  0x21   :  { %v673_v4 = vmin.f32 %v52_v59, 1.0  ;;  %v675_v6 = vmin.f32 %v53_v62, 1.0  ;;  %v677_v15 = vmin.f32 %v54_v63, 1.0  ;;  %v200_v16 = vand.u32 15, %v184_v12 }
  0x22   :  { %139 = vst [vmem:[#allocation5 + $0x18] sm:$0xff] %v498_v60  ;;  %v215_v17 = vshra.s32 %v629_v13, 2  ;;  %140 = vst [vmem:[#allocation5 + $0x20] sm:$0xff] %v499_v0  ;;  %v500_v21 = vpack.c.bf16 %v671_v1, %v667_v61  ;;  %v682_v22 = vmin.f32 %v55_v5, 1.0  ;;  %v232_v23 = vshra.s32 %v168_v11, 2 }
  0x23   :  { %v247_v24 = vmul.u32 8, %v631_v14  ;;  %v501_v25 = vpack.c.bf16 %v675_v6, %v673_v4  ;;  %v216_v26 = vshra.s32 %v200_v16, 2  ;;  %v690_v12 = vmul.u32 64, %v633_v18 }
  0x24   :  { %v313_v27 = vand.u32 3, %v629_v13  ;;  %141 = vst [vmem:[#allocation5 + $0x28] sm:$0xff] %v500_v21  ;;  %v502_v28 = vpack.c.bf16 %v682_v22, %v677_v15  ;;  %v248_v29 = vmul.u32 8, %v232_v23  ;;  %v314_v31 = vand.u32 3, %v200_v16 }
  0x25   :  { %v263_v30 = vadd.s32 %v247_v24, %v215_v17  ;;  %142 = vst [vmem:[#allocation5 + $0x30] sm:$0xff] %v501_v25  ;;  %v330_v14 = vand.u32 3, %v168_v11  ;;  %v345_v32 = vmul.u32 4, %v635_v19  ;;  %vm410_vm0 = vcmp.ne.f32.partialorder %v639_v33, 0.0 }
  0x26   :  { %vm411_vm1 = vcmp.ne.f32.partialorder %v641_v34, 0.0  ;;  %143 = vst [vmem:[#allocation5 + $0x38] sm:$0xff] %v502_v28  ;;  %v264_v13 = vadd.s32 %v248_v29, %v216_v26  ;;  %v169_v36 = vshra.s32 %v616_v7, 7  ;;  %v170_v37 = vshra.s32 %v619_v8, 7 }
  0x27   :  { %v281_v18 = vadd.s32 %v690_v12, %v263_v30  ;;  %v346_v38 = vmul.u32 4, %v330_v14  ;;  %v361_v42 = vadd.s32 %v345_v32, %v313_v27  ;;  %v185_v43 = vshra.s32 %v616_v7, 3 }
  0x28   :  { %v186_v3 = vshra.s32 %v619_v8, 3 }
  0x29   :  { %539 = shalt.err (!%p536_p12)
}
  0x2a   :  { %s540_s25 = scalar_lea.hbm %s815_s1, 1024 }
  0x2b   :  { %p541_p13 = scmp.ne.s32.totalorder %s815_s1, %s540_s25  ;;  %p544_p0 = scmp.lt.u32.totalorder %s540_s25, %s815_s1 }
  0x2d   :  { %p546_p1 = pnand %p544_p0, %p541_p13 }
  0x2f   :  { %549 = shalt.err (!%p546_p1)
}
  0x30   :  { %467 = dma.vmem_to_hbm [thread:$0]  %s465_s21, 1024, %s815_s1, [#allocation4]   ;;  %v282_v7 = vadd.s32 %v690_v12, %v264_v13  ;;  %v297_v8 = vmul.u32 64, %v281_v18  ;;  %v233_v11 = vshra.s32 %v169_v36, 2  ;;  %v234_v19 = vshra.s32 %v170_v37, 2 }
  0x31   :  { %v362_v44 = vadd.s32 %v346_v38, %v314_v31  ;;  %v378_v45 = vadd.s32 %v637_v20, %v361_v42  ;;  %v201_v47 = vand.u32 15, %v185_v43  ;;  %v202_v48 = vand.u32 15, %v186_v3  ;;  %s580_s1 = smov [#allocation6]  }
  0x32   :  { %v298_v49 = vmul.u32 64, %v282_v7  ;;  %v249_v50 = vmul.u32 8, %v233_v11  ;;  %v331_v51 = vand.u32 3, %v169_v36  ;;  %v332_v52 = vand.u32 3, %v170_v37  ;;  %s474_s4 = sshll.u32 %s580_s1, 4  ;;  %s475_s4 = int_to_ptr.vmem [resolvable:$true] %s474_s4 }
  0x33   :  { %v379_v54 = vadd.s32 %v637_v20, %v362_v44  ;;  %v394_v55 = vadd.s32 %v378_v45, %v297_v8  ;;  %v217_v58 = vshra.s32 %v201_v47, 2  ;;  %v218_v59 = vshra.s32 %v202_v48, 2  ;;  %s550_s5 = scalar_lea.vmem %s475_s4, 1024  ;;  %p555_p3 = scmp.lt.s32.totalorder %s475_s4, %s475_s4 }
  0x34   :  { %v250_v60 = vmul.u32 8, %v234_v19  ;;  %v315_v62 = vand.u32 3, %v201_v47  ;;  %v316_v63 = vand.u32 3, %v202_v48  ;;  %v347_v0 = vmul.u32 4, %v331_v51  ;;  %p551_p2 = scmp.ne.s32.totalorder %s475_s4, %s550_s5  ;;  %p556_p4 = scmp.lt.s32.totalorder %s550_s5, %s550_s5 }
  0x35   :  { %v395_v5 = vadd.s32 %v379_v54, %v298_v49  ;;  %v426_v16 = vsel %vm410_vm0, %v394_v55, 4294967295  ;;  %v265_v17 = vadd.s32 %v249_v50, %v217_v58  ;;  %v348_v21 = vmul.u32 4, %v332_v52 }
  0x36   :  { %v266_v23 = vadd.s32 %v250_v60, %v218_v59  ;;  %v363_v24 = vadd.s32 %v347_v0, %v315_v62  ;;  %vm412_vm2 = vcmp.ne.f32.partialorder %v643_v35, 0.0  ;;  %vm413_vm3 = vcmp.ne.f32.partialorder %v645_v39, 0.0  ;;  %p557_p5 = por %p556_p4, %p555_p3 }
  0x37   :  { %v427_v25 = vsel %vm411_vm1, %v395_v5, 4294967295  ;;  %v283_v26 = vadd.s32 %v690_v12, %v265_v17  ;;  %v364_v27 = vadd.s32 %v348_v21, %v316_v63  ;;  %v171_v28 = vshra.s32 %v622_v9, 7 }
  0x38   :  { %v442_v29 = vpack.c.b16 %v427_v25, %v426_v16  ;;  %v284_v33 = vadd.s32 %v690_v12, %v266_v23  ;;  %v380_v30 = vadd.s32 %v637_v20, %v363_v24  ;;  %v172_v31 = vshra.s32 %v625_v10, 7  ;;  %p558_p6 = pnand %p557_p5, %p551_p2 }
  0x39   :  { %v299_v14 = vmul.u32 64, %v283_v26  ;;  %v381_v32 = vadd.s32 %v637_v20, %v364_v27  ;;  %v187_v13 = vshra.s32 %v622_v9, 3  ;;  %v188_v34 = vshra.s32 %v625_v10, 3 }
  0x3a   :  { %450 = vst [vmem:[#allocation6] sm:$0xff] %v442_v29  ;;  %v300_v18 = vmul.u32 64, %v284_v33  ;;  %v235_v36 = vshra.s32 %v171_v28, 2  ;;  %v236_v37 = vshra.s32 %v172_v31, 2  ;;  %v333_v38 = vand.u32 3, %v171_v28 }
  0x3b   :  { %v396_v42 = vadd.s32 %v380_v30, %v299_v14  ;;  %v203_v43 = vand.u32 15, %v187_v13  ;;  %v204_v3 = vand.u32 15, %v188_v34  ;;  %v334_v7 = vand.u32 3, %v172_v31 }
  0x3c   :  { %v397_v8 = vadd.s32 %v381_v32, %v300_v18  ;;  %v251_v11 = vmul.u32 8, %v235_v36  ;;  %v252_v19 = vmul.u32 8, %v236_v37  ;;  %v156_v59 = vadd.s32 768, %v608_v2 }
  0x3d   :  { %v428_v44 = vsel %vm412_vm2, %v396_v42, 4294967295  ;;  %v219_v45 = vshra.s32 %v203_v43, 2  ;;  %v220_v47 = vshra.s32 %v204_v3, 2  ;;  %v317_v9 = vand.u32 3, %v203_v43 }
  0x3e   :  { %v429_v10 = vsel %vm413_vm3, %v397_v8, 4294967295  ;;  %v318_v48 = vand.u32 3, %v204_v3  ;;  %v349_v49 = vmul.u32 4, %v333_v38  ;;  %v350_v50 = vmul.u32 4, %v334_v7 }
  0x3f   :  { %v443_v51 = vpack.c.b16 %v429_v10, %v428_v44  ;;  %v267_v52 = vadd.s32 %v251_v11, %v219_v45  ;;  %v268_v54 = vadd.s32 %v252_v19, %v220_v47  ;;  %v157_v60 = vadd.s32 896, %v608_v2 }
  0x40   :  { %v365_v55 = vadd.s32 %v349_v49, %v317_v9  ;;  %v366_v58 = vadd.s32 %v350_v50, %v318_v48  ;;  %vm414_vm4 = vcmp.ne.f32.partialorder %v647_v40, 0.0  ;;  %vm415_vm5 = vcmp.ne.f32.partialorder %v649_v41, 0.0 }
  0x41   :  { %451 = vst [vmem:[#allocation6 + $0x8] sm:$0xff] %v443_v51  ;;  %v285_v35 = vadd.s32 %v690_v12, %v267_v52  ;;  %v286_v62 = vadd.s32 %v690_v12, %v268_v54  ;;  %v173_v0 = vshra.s32 %v156_v59, 7  ;;  %v174_v5 = vshra.s32 %v157_v60, 7 }
  0x42   :  { %v382_v39 = vadd.s32 %v637_v20, %v365_v55  ;;  %v383_v63 = vadd.s32 %v637_v20, %v366_v58  ;;  %v189_v21 = vshra.s32 %v156_v59, 3  ;;  %v190_v23 = vshra.s32 %v157_v60, 3 }
  0x43   :  { %v301_v16 = vmul.u32 64, %v285_v35  ;;  %v302_v17 = vmul.u32 64, %v286_v62  ;;  %v237_v24 = vshra.s32 %v173_v0, 2  ;;  %v238_v25 = vshra.s32 %v174_v5, 2 }
  0x44   :  { %v335_v26 = vand.u32 3, %v173_v0  ;;  %v336_v27 = vand.u32 3, %v174_v5  ;;  %v205_v33 = vand.u32 15, %v189_v21  ;;  %v206_v30 = vand.u32 15, %v190_v23 }
  0x45   :  { %v398_v28 = vadd.s32 %v382_v39, %v301_v16  ;;  %v399_v29 = vadd.s32 %v383_v63, %v302_v17  ;;  %v253_v31 = vmul.u32 8, %v237_v24  ;;  %v254_v14 = vmul.u32 8, %v238_v25 }
  0x46   :  { %vm416_vm6 = vcmp.ne.f32.partialorder %v653_v46, 0.0  ;;  %vm417_vm7 = vcmp.ne.f32.partialorder %v659_v53, 0.0  ;;  %v158_v32 = vadd.s32 1024, %v608_v2  ;;  %v159_v13 = vadd.s32 1152, %v608_v2 }
  0x47   :  { %v430_v34 = vsel %vm414_vm4, %v398_v28, 4294967295  ;;  %v431_v18 = vsel %vm415_vm5, %v399_v29, 4294967295  ;;  %v221_v36 = vshra.s32 %v205_v33, 2  ;;  %v222_v37 = vshra.s32 %v206_v30, 2 }
  0x48   :  { %v444_v38 = vpack.c.b16 %v431_v18, %v430_v34  ;;  %v319_v42 = vand.u32 3, %v205_v33  ;;  %v320_v43 = vand.u32 3, %v206_v30  ;;  %v351_v3 = vmul.u32 4, %v335_v26 }
  0x49   :  { %v269_v7 = vadd.s32 %v253_v31, %v221_v36  ;;  %v270_v8 = vadd.s32 %v254_v14, %v222_v37  ;;  %v352_v11 = vmul.u32 4, %v336_v27  ;;  %v175_v19 = vshra.s32 %v158_v32, 7 }
  0x4a   :  { %452 = vst [vmem:[#allocation6 + $0x10] sm:$0xff] %v444_v38  ;;  %v367_v44 = vadd.s32 %v351_v3, %v319_v42  ;;  %v176_v45 = vshra.s32 %v159_v13, 7  ;;  %v191_v47 = vshra.s32 %v158_v32, 3  ;;  %v192_v9 = vshra.s32 %v159_v13, 3 }
  0x4b   :  { %v287_v40 = vadd.s32 %v690_v12, %v269_v7  ;;  %v288_v41 = vadd.s32 %v690_v12, %v270_v8  ;;  %v368_v10 = vadd.s32 %v352_v11, %v320_v43  ;;  %v239_v48 = vshra.s32 %v175_v19, 2 }
  0x4c   :  { %v384_v49 = vadd.s32 %v637_v20, %v367_v44  ;;  %v207_v50 = vand.u32 15, %v191_v47  ;;  %v208_v51 = vand.u32 15, %v192_v9  ;;  %v240_v52 = vshra.s32 %v176_v45, 2 }
  0x4d   :  { %v303_v54 = vmul.u32 64, %v287_v40  ;;  %v304_v55 = vmul.u32 64, %v288_v41  ;;  %v385_v58 = vadd.s32 %v637_v20, %v368_v10  ;;  %v337_v59 = vand.u32 3, %v175_v19 }
  0x4e   :  { %v223_v60 = vshra.s32 %v207_v50, 2  ;;  %v224_v35 = vshra.s32 %v208_v51, 2  ;;  %v255_v62 = vmul.u32 8, %v239_v48  ;;  %v256_v39 = vmul.u32 8, %v240_v52 }
  0x4f   :  { %v400_v63 = vadd.s32 %v384_v49, %v303_v54  ;;  %v401_v0 = vadd.s32 %v385_v58, %v304_v55  ;;  %v321_v5 = vand.u32 3, %v207_v50  ;;  %v322_v16 = vand.u32 3, %v208_v51 }
  0x50   :  { %v271_v17 = vadd.s32 %v255_v62, %v223_v60  ;;  %v272_v21 = vadd.s32 %v256_v39, %v224_v35  ;;  %v338_v23 = vand.u32 3, %v176_v45  ;;  %v353_v24 = vmul.u32 4, %v337_v59 }
  0x51   :  { %v432_v25 = vsel %vm416_vm6, %v400_v63, 4294967295  ;;  %v433_v26 = vsel %vm417_vm7, %v401_v0, 4294967295  ;;  %vm418_vm8 = vcmp.ne.f32.partialorder %v661_v56, 0.0  ;;  %v160_v31 = vadd.s32 1280, %v608_v2 }
  0x52   :  { %v445_v27 = vpack.c.b16 %v433_v26, %v432_v25  ;;  %v289_v28 = vadd.s32 %v690_v12, %v271_v17  ;;  %v290_v29 = vadd.s32 %v690_v12, %v272_v21  ;;  %v354_v33 = vmul.u32 4, %v338_v23 }
  0x53   :  { %v369_v30 = vadd.s32 %v353_v24, %v321_v5  ;;  %v161_v14 = vadd.s32 1408, %v608_v2  ;;  %vm419_vm9 = vcmp.ne.f32.partialorder %v663_v57, 0.0  ;;  %v177_v34 = vshra.s32 %v160_v31, 7 }
  0x54   :  { %453 = vst [vmem:[#allocation6 + $0x18] sm:$0xff] %v445_v27  ;;  %v305_v32 = vmul.u32 64, %v289_v28  ;;  %v306_v46 = vmul.u32 64, %v290_v29  ;;  %v370_v13 = vadd.s32 %v354_v33, %v322_v16  ;;  %v193_v36 = vshra.s32 %v160_v31, 3 }
  0x55   :  { %v386_v53 = vadd.s32 %v637_v20, %v369_v30  ;;  %v178_v18 = vshra.s32 %v161_v14, 7  ;;  %v194_v38 = vshra.s32 %v161_v14, 3  ;;  %v162_v42 = vadd.s32 1536, %v608_v2 }
  0x56   :  { %v387_v37 = vadd.s32 %v637_v20, %v370_v13  ;;  %v163_v43 = vadd.s32 1664, %v608_v2  ;;  %v209_v7 = vand.u32 15, %v193_v36  ;;  %v241_v8 = vshra.s32 %v177_v34, 2 }
  0x57   :  { %v402_v3 = vadd.s32 %v386_v53, %v305_v32  ;;  %v242_v11 = vshra.s32 %v178_v18, 2  ;;  %v210_v44 = vand.u32 15, %v194_v38  ;;  %v339_v45 = vand.u32 3, %v177_v34 }
  0x58   :  { %v403_v19 = vadd.s32 %v387_v37, %v306_v46  ;;  %v340_v47 = vand.u32 3, %v178_v18  ;;  %vm420_vm10 = vcmp.ne.f32.partialorder %v667_v61, 0.0  ;;  %v225_v40 = vshra.s32 %v209_v7, 2 }
  0x59   :  { %v434_v9 = vsel %vm418_vm8, %v402_v3, 4294967295  ;;  %v257_v41 = vmul.u32 8, %v241_v8  ;;  %v258_v10 = vmul.u32 8, %v242_v11  ;;  %vm421_vm11 = vcmp.ne.f32.partialorder %v671_v1, 0.0 }
  0x5a   :  { %v435_v48 = vsel %vm419_vm9, %v403_v19, 4294967295  ;;  %v226_v49 = vshra.s32 %v210_v44, 2  ;;  %v323_v50 = vand.u32 3, %v209_v7  ;;  %v324_v51 = vand.u32 3, %v210_v44 }
  0x5b   :  { %v446_v52 = vpack.c.b16 %v435_v48, %v434_v9  ;;  %v273_v54 = vadd.s32 %v257_v41, %v225_v40  ;;  %v355_v55 = vmul.u32 4, %v339_v45  ;;  %v356_v58 = vmul.u32 4, %v340_v47 }
  0x5c   :  { %v274_v59 = vadd.s32 %v258_v10, %v226_v49  ;;  %v179_v60 = vshra.s32 %v162_v42, 7  ;;  %v180_v35 = vshra.s32 %v163_v43, 7  ;;  %v195_v56 = vshra.s32 %v162_v42, 3 }
  0x5d   :  { %454 = vst [vmem:[#allocation6 + $0x20] sm:$0xff] %v446_v52  ;;  %v291_v62 = vadd.s32 %v690_v12, %v273_v54  ;;  %v371_v39 = vadd.s32 %v355_v55, %v323_v50  ;;  %v372_v63 = vadd.s32 %v356_v58, %v324_v51  ;;  %v196_v0 = vshra.s32 %v163_v43, 3 }
  0x5e   :  { %v292_v57 = vadd.s32 %v690_v12, %v274_v59  ;;  %v211_v5 = vand.u32 15, %v195_v56  ;;  %v243_v16 = vshra.s32 %v179_v60, 2  ;;  %v244_v17 = vshra.s32 %v180_v35, 2 }
  0x5f   :  { %v307_v21 = vmul.u32 64, %v291_v62  ;;  %v388_v23 = vadd.s32 %v637_v20, %v371_v39  ;;  %v389_v24 = vadd.s32 %v637_v20, %v372_v63  ;;  %v212_v25 = vand.u32 15, %v196_v0 }
  0x60   :  { %v308_v26 = vmul.u32 64, %v292_v57  ;;  %v227_v27 = vshra.s32 %v211_v5, 2  ;;  %v259_v28 = vmul.u32 8, %v243_v16  ;;  %v325_v29 = vand.u32 3, %v211_v5 }
  0x61   :  { %v404_v33 = vadd.s32 %v388_v23, %v307_v21  ;;  %v228_v30 = vshra.s32 %v212_v25, 2  ;;  %v260_v31 = vmul.u32 8, %v244_v17  ;;  %v326_v14 = vand.u32 3, %v212_v25 }
  0x62   :  { %v405_v32 = vadd.s32 %v389_v24, %v308_v26  ;;  %v275_v46 = vadd.s32 %v259_v28, %v227_v27  ;;  %v341_v13 = vand.u32 3, %v179_v60  ;;  %v342_v53 = vand.u32 3, %v180_v35 }
  0x63   :  { %v436_v34 = vsel %vm420_vm10, %v404_v33, 4294967295  ;;  %v276_v18 = vadd.s32 %v260_v31, %v228_v30  ;;  %v164_v7 = vadd.s32 1792, %v608_v2  ;;  %v165_v8 = vadd.s32 1920, %v608_v2 }
  0x64   :  { %v437_v36 = vsel %vm421_vm11, %v405_v32, 4294967295  ;;  %v293_v37 = vadd.s32 %v690_v12, %v275_v46  ;;  %v357_v38 = vmul.u32 4, %v341_v13  ;;  %v358_v42 = vmul.u32 4, %v342_v53 }
  0x65   :  { %v447_v43 = vpack.c.b16 %v437_v36, %v436_v34  ;;  %v294_v3 = vadd.s32 %v690_v12, %v276_v18  ;;  %vm422_vm12 = vcmp.ne.f32.partialorder %v673_v4, 0.0  ;;  %v181_v1 = vshra.s32 %v164_v7, 7 }
  0x66   :  { %v309_v11 = vmul.u32 64, %v293_v37  ;;  %v373_v19 = vadd.s32 %v357_v38, %v325_v29  ;;  %v374_v44 = vadd.s32 %v358_v42, %v326_v14  ;;  %v182_v45 = vshra.s32 %v165_v8, 7 }
  0x67   :  { %455 = vst [vmem:[#allocation6 + $0x28] sm:$0xff] %v447_v43  ;;  %v310_v61 = vmul.u32 64, %v294_v3  ;;  %v197_v47 = vshra.s32 %v164_v7, 3  ;;  %vm423_vm13 = vcmp.ne.f32.partialorder %v675_v6, 0.0  ;;  %v198_v41 = vshra.s32 %v165_v8, 3 }
  0x68   :  { %v390_v9 = vadd.s32 %v637_v20, %v373_v19  ;;  %v391_v40 = vadd.s32 %v637_v20, %v374_v44  ;;  %v245_v48 = vshra.s32 %v181_v1, 2  ;;  %v246_v2 = vshra.s32 %v182_v45, 2 }
  0x69   :  { %v213_v10 = vand.u32 15, %v197_v47  ;;  %v343_v49 = vand.u32 3, %v181_v1  ;;  %v214_v52 = vand.u32 15, %v198_v41  ;;  %v344_v54 = vand.u32 3, %v182_v45 }
  0x6a   :  { %v406_v50 = vadd.s32 %v390_v9, %v309_v11  ;;  %v407_v51 = vadd.s32 %v391_v40, %v310_v61  ;;  %v261_v58 = vmul.u32 8, %v245_v48  ;;  %v262_v59 = vmul.u32 8, %v246_v2 }
  0x6b   :  { %v229_v55 = vshra.s32 %v213_v10, 2  ;;  %v327_v60 = vand.u32 3, %v213_v10  ;;  %v230_v62 = vshra.s32 %v214_v52, 2  ;;  %v328_v39 = vand.u32 3, %v214_v52 }
  0x6c   :  { %v438_v35 = vsel %vm422_vm12, %v406_v50, 4294967295  ;;  %v439_v56 = vsel %vm423_vm13, %v407_v51, 4294967295  ;;  %v359_v0 = vmul.u32 4, %v343_v49  ;;  %v360_v57 = vmul.u32 4, %v344_v54 }
  0x6d   :  { %v448_v6 = vpack.c.b16 %v439_v56, %v438_v35  ;;  %v277_v63 = vadd.s32 %v261_v58, %v229_v55  ;;  %v278_v5 = vadd.s32 %v262_v59, %v230_v62  ;;  %vm424_vm14 = vcmp.ne.f32.partialorder %v677_v15, 0.0 }
  0x6e   :  { %v375_v17 = vadd.s32 %v359_v0, %v327_v60  ;;  %v376_v21 = vadd.s32 %v360_v57, %v328_v39  ;;  %vm425_vm15 = vcmp.ne.f32.partialorder %v682_v22, 0.0 }
  0x6f   :  { %456 = vst [vmem:[#allocation6 + $0x30] sm:$0xff] %v448_v6  ;;  %v295_v16 = vadd.s32 %v690_v12, %v277_v63  ;;  %v296_v23 = vadd.s32 %v690_v12, %v278_v5 }
  0x70   :  { %v392_v25 = vadd.s32 %v637_v20, %v375_v17  ;;  %v393_v4 = vadd.s32 %v637_v20, %v376_v21 }
  0x71   :  { %v311_v24 = vmul.u32 64, %v295_v16  ;;  %v312_v26 = vmul.u32 64, %v296_v23 }
  0x73   :  { %v408_v27 = vadd.s32 %v392_v25, %v311_v24  ;;  %v409_v28 = vadd.s32 %v393_v4, %v312_v26 }
  0x75   :  { %v440_v29 = vsel %vm424_vm14, %v408_v27, 4294967295  ;;  %v441_v33 = vsel %vm425_vm15, %v409_v28, 4294967295 }
  0x76   :  { %v449_v30 = vpack.c.b16 %v441_v33, %v440_v29 }
  0x78   :  { %457 = vst [vmem:[#allocation6 + $0x38] sm:$0xff] %v449_v30 }
  0x79   :  { %561 = shalt.err (!%p558_p6)
}
  0x7a   :  { %s562_s8 = scalar_lea.hbm %s816_s2, 1024 }
  0x7b   :  { %p563_p7 = scmp.ne.s32.totalorder %s816_s2, %s562_s8  ;;  %p566_p8 = scmp.lt.u32.totalorder %s562_s8, %s816_s2 }
  0x7d   :  { %p568_p9 = pnand %p566_p8, %p563_p7 }
  0x7f   :  { %571 = shalt.err (!%p568_p9)
}
  0x80   :  { %477 = dma.vmem_to_hbm [thread:$0]  %s475_s4, 1024, %s816_s2, [#allocation7]  }
  0x81   :  { %574 = dma.done.wait [#allocation4], 1024  }
  0x82   :  { %575 = vsyncadd [#allocation4], 4294966272 }
  0x83   :  { %576 = dma.done.wait [#allocation7], 1024  }
  0x84   :  { %577 = vsyncadd [#allocation7], 4294966272 }
  0x85   :  { %484 = vsyncpa [#allocation3], 1 }
  0x86   :  { %485 = vsyncpa [#allocation4], 1 }
  0x87   :  { %486 = vsyncpa [#allocation7], 1 }

</bundles_post_ra>
